<compile_context>
chip_gen: v7x
topology: tpu7x:2x2x1
jax: 0.10.0
libtpu: 0.0.40
codegen_flags: <defaults>
</compile_context>

<pallas_src>
import functools

import jax
import jax.numpy as jnp
import numpy as np
from jax import lax
from jax.experimental import pallas as pl
from jax.experimental.pallas import tpu as pltpu


def _fast_pow(x, p):
    """x ** p via repeated squaring when p is a small non-negative integer.

    jnp.power with a float exponent lowers to exp(log(x)) (2 EUP ops/element); for the
    default focal-loss exponents (alpha=2, beta=4) this is 1-2 VPU multiplies instead,
    and it also dodges pow(0., float) edge cases.
    """
    pf = float(p)
    if pf.is_integer() and 0.0 <= pf <= 32.0:
        n = int(pf)
        if n == 0:
            return jnp.ones_like(x)
        result = None
        base = x
        while n:
            if n & 1:
                result = base if result is None else result * base
            n >>= 1
            if n:
                base = base * base
        return result
    return jnp.power(x, pf)  # non-integer exponent fallback (EUP exp+log)


def _focal_sums_kernel(alpha, beta, eps, num_inter, chw, tile,
                       out_ref, gt_ref, mask_ref, sums_ref):
    """One grid step = one CHW tile, all intermediates.

    out_ref : (B, I, TILE) raw logits        (VMEM)
    gt_ref  : (B, TILE)    heatmap targets   (VMEM)
    mask_ref: (B, TILE)    positive mask     (VMEM)
    sums_ref: (1, 2*I + 1) partial sums      (SMEM)
              layout: [pos_0, neg_0, pos_1, neg_1, ..., pos_{I-1}, neg_{I-1}, mask_sum]
    """
    gt = gt_ref[...].astype(jnp.float32)     # (B, TILE)
    m = mask_ref[...].astype(jnp.float32)    # (B, TILE)

    needs_tail_mask = (chw % tile) != 0      # static Python branch
    if needs_tail_mask:
        t = pl.program_id(0)
        col = t * tile + lax.broadcasted_iota(jnp.int32, gt.shape, 1)
        valid = col < chw
        # In padding: gt=1 -> (1-gt)^beta == 0 kills the neg term; m=0 kills the pos
        # term and keeps num_pos exact.
        gt = jnp.where(valid, gt, 1.0)
        m = jnp.where(valid, m, 0.0)

    # Intermediate-invariant factors: computed once per tile, reused for every i.
    neg_factor = _fast_pow(1.0 - gt, beta) * (1.0 - m)   # (1 - gt)^beta * neg_inds
    sums_ref[0, 2 * num_inter] = jnp.sum(m)

    # NOTE: log(sigmoid(x)+eps) could be folded into -softplus(-x) to save EUP ops,
    # but that moves eps; kept exact to match the PyTorch module.
    for i in range(num_inter):
        logits = out_ref[:, i, :].astype(jnp.float32)    # (B, TILE)
        if needs_tail_mask:
            logits = jnp.where(valid, logits, 0.0)       # keep NaN garbage out of padding
        pred = jax.nn.sigmoid(logits)                    # output.sigmoid()
        pos = jnp.log(pred + eps) * _fast_pow(1.0 - pred, alpha) * m
        neg = jnp.log(1.0 - pred + eps) * _fast_pow(pred, alpha) * neg_factor
        sums_ref[0, 2 * i] = jnp.sum(pos)
        sums_ref[0, 2 * i + 1] = jnp.sum(neg)


def criterion_forward(outputs, heatmap, mask, alpha=2.0, beta=4.0, eps=1e-7, tile=None):
    """JAX equivalent of Criterion.forward.

    outputs: (B, I, C, H, W) raw logits (sigmoid applied inside the kernel)
    heatmap: (B, C, H, W)
    mask   : (B, C, H, W)
    returns: scalar loss (float32)
    """
    B, I, C, H, W = outputs.shape
    CHW = C * H * W

    # Free reshapes only -- no transpose / astype copy of the big logits tensor.
    outputs_r = outputs.reshape(B, I, CHW)
    heatmap_r = heatmap.reshape(B, CHW)
    mask_r = mask.reshape(B, CHW)

    if tile is None:
        # ~0.5 MiB of raw block data per step: big enough to amortize the per-step
        # overhead / run near HBM roofline, small enough (with double buffering and
        # sublane padding) to fit the scoped-VMEM defaults on v5e/v6e/v7x.
        target_bytes = 512 * 1024
        tile = (target_bytes // (4 * B * (I + 2))) // 128 * 128
        tile = max(128, min(tile, 8192))
    if tile >= CHW:
        tile = CHW                       # single full-width tile (last-dim == full dim)
    num_tiles = -(-CHW // tile)          # cdiv; tail tile masked inside the kernel

    kernel = functools.partial(
        _focal_sums_kernel, float(alpha), float(beta), float(eps), I, CHW, tile)

    sums = pl.pallas_call(
        kernel,
        out_shape=jax.ShapeDtypeStruct((num_tiles, 2 * I + 1), jnp.float32),
        grid=(num_tiles,),
        in_specs=[
            pl.BlockSpec((B, I, tile), lambda t: (0, 0, t)),   # all intermediates per tile
            pl.BlockSpec((B, tile), lambda t: (0, t)),          # heatmap streamed once
            pl.BlockSpec((B, tile), lambda t: (0, t)),          # mask streamed once
        ],
        out_specs=pl.BlockSpec((1, 2 * I + 1), lambda t: (t, 0),
                               memory_space=pltpu.SMEM),
        compiler_params=pltpu.CompilerParams(
            dimension_semantics=("parallel",)),                 # lets v7x use both TCs
    )(outputs_r, heatmap_r, mask_r)

    pos_total = jnp.sum(sums[:, 0:2 * I:2], axis=0)             # (I,)
    neg_total = jnp.sum(sums[:, 1:2 * I:2], axis=0)             # (I,)
    num_pos = jnp.clip(jnp.sum(sums[:, 2 * I]), 1.0, 1e30)      # mask.sum().clamp(1, 1e30)

    # pos_loss.sum(dim=[1,2,3]).mean()  ==  total_sum / batch_size
    per_intermediate = -(pos_total / B + neg_total / B) / num_pos
    return jnp.mean(per_intermediate)                           # sum(losses) / len(losses)


def criterion_reference(outputs, heatmap, mask, alpha=2.0, beta=4.0, eps=1e-7):
    """Pure-JAX reference mirroring the PyTorch module, for verification."""
    I = outputs.shape[1]
    losses = []
    for i in range(I):
        pred = jax.nn.sigmoid(outputs[:, i].astype(jnp.float32))
        neg_inds = 1.0 - mask
        neg_w = jnp.power(1.0 - heatmap, beta)
        pos = jnp.log(pred + eps) * jnp.power(1.0 - pred, alpha) * mask
        neg = jnp.log(1.0 - pred + eps) * jnp.power(pred, alpha) * neg_w * neg_inds
        pos_l = jnp.mean(jnp.sum(pos, axis=(1, 2, 3)))
        neg_l = jnp.mean(jnp.sum(neg, axis=(1, 2, 3)))
        num_pos = jnp.clip(jnp.sum(mask), 1.0, 1e30)
        losses.append(-(pos_l + neg_l) / num_pos)
    return sum(losses) / I


# TODO(synk): calc_pixel_dist / calc_confusion are host-side NumPy metric helpers
# (not part of the differentiable forward pass) and are intentionally not ported.

if __name__ == "__main__":
    # Criterion has no learnable parameters; alpha/beta are constructor constants.
    B, I, C, H, W = 2, 3, 4, 16, 16
    alpha, beta = 2.0, 4.0

    key = jax.random.PRNGKey(0)
    k_out, k_hm, k_mask = jax.random.split(key, 3)

    outputs = jax.random.normal(k_out, (B, I, C, H, W), dtype=jnp.float32)       # logits
    heatmap = jax.random.uniform(k_hm, (B, C, H, W), dtype=jnp.float32)           # in [0, 1)
    mask = (jax.random.uniform(k_mask, (B, C, H, W)) < 0.1).astype(jnp.float32)   # sparse positives

    ref = jax.block_until_ready(criterion_reference(outputs, heatmap, mask, alpha, beta))

    # 1) Default tiling (single full-width tile at this small size).
    loss = jax.block_until_ready(criterion_forward(outputs, heatmap, mask, alpha, beta))
    np.testing.assert_allclose(np.asarray(loss), np.asarray(ref), rtol=1e-5, atol=1e-6)

    # 2) Forced multi-tile path with a non-dividing tile (exercises tail masking,
    #    per-tile partial sums, and the parallel grid).
    loss_tiled = jax.block_until_ready(
        criterion_forward(outputs, heatmap, mask, alpha, beta, tile=384))
    np.testing.assert_allclose(np.asarray(loss_tiled), np.asarray(ref), rtol=1e-5, atol=1e-6)

    print("KERNEL_OK")
</pallas_src>

<mosaic_0001>
module attributes {stable_mosaic.version = 11 : i64} {
  func.func @_focal_sums_kernel(%arg0: i32, %arg1: memref<2x3x1024xf32, #tpu.memory_space<vmem>>, %arg2: memref<2x1024xf32, #tpu.memory_space<vmem>>, %arg3: memref<2x1024xf32, #tpu.memory_space<vmem>>, %arg4: memref<1x7xf32, #tpu.memory_space<smem>>) attributes {dimension_semantics = [#tpu.dimension_semantics<parallel>], iteration_bounds = array<i64: 1>, scalar_prefetch = 0 : i64, scratch_operands = 0 : i64, tpu.core_type = #tpu.core_type<tc>, window_params = [{transform_indices = @transform_0, window_bounds = array<i64: 2, 3, 1024>}, {transform_indices = @transform_1, window_bounds = array<i64: 2, 1024>}, {transform_indices = @transform_2, window_bounds = array<i64: 2, 1024>}, {transform_indices = @transform_3, window_bounds = array<i64: 1, 7>}]} {
    %c0 = arith.constant 0 : index
    %c0_0 = arith.constant 0 : index
    %0 = vector.load %arg2[%c0, %c0_0] : memref<2x1024xf32, #tpu.memory_space<vmem>>, vector<2x1024xf32>
    %c0_1 = arith.constant 0 : index
    %c0_2 = arith.constant 0 : index
    %1 = vector.load %arg3[%c0_1, %c0_2] : memref<2x1024xf32, #tpu.memory_space<vmem>>, vector<2x1024xf32>
    %cst = arith.constant 1.000000e+00 : f32
    %2 = vector.broadcast %cst : f32 to vector<2x1024xf32>
    %3 = arith.subf %2, %0 : vector<2x1024xf32>
    %4 = arith.mulf %3, %3 : vector<2x1024xf32>
    %5 = arith.mulf %4, %4 : vector<2x1024xf32>
    %cst_3 = arith.constant 1.000000e+00 : f32
    %6 = vector.broadcast %cst_3 : f32 to vector<2x1024xf32>
    %7 = arith.subf %6, %1 : vector<2x1024xf32>
    %8 = arith.mulf %5, %7 : vector<2x1024xf32>
    %9 = vector.shape_cast %1 : vector<2x1024xf32> to vector<1x2x1024xf32>
    %cst_4 = arith.constant dense<0.000000e+00> : vector<1xf32>
    %10 = vector.multi_reduction <add>, %9, %cst_4 [1, 2] : vector<1x2x1024xf32> to vector<1xf32>
    %11 = vector.shape_cast %10 : vector<1xf32> to vector<1x1x1xf32>
    %12 = vector.extract %11[0, 0, 0] : f32 from vector<1x1x1xf32>
    %c0_5 = arith.constant 0 : index
    %c6 = arith.constant 6 : index
    %13 = memref.load %arg4[%c0_5, %c6] : memref<1x7xf32, #tpu.memory_space<smem>>
    memref.store %12, %arg4[%c0_5, %c6] : memref<1x7xf32, #tpu.memory_space<smem>>
    %c0_6 = arith.constant 0 : index
    %c0_7 = arith.constant 0 : index
    %c0_8 = arith.constant 0 : index
    %14 = vector.load %arg1[%c0_6, %c0_7, %c0_8] : memref<2x3x1024xf32, #tpu.memory_space<vmem>>, vector<2x1x1024xf32>
    %15 = vector.shape_cast %14 : vector<2x1x1024xf32> to vector<2x1024xf32>
    %16 = arith.negf %15 : vector<2x1024xf32>
    %17 = math.exp %16 : vector<2x1024xf32>
    %cst_9 = arith.constant 1.000000e+00 : f32
    %18 = vector.broadcast %cst_9 : f32 to vector<2x1024xf32>
    %19 = arith.addf %18, %17 : vector<2x1024xf32>
    %20 = arith.divf %18, %19 : vector<2x1024xf32>
    %cst_10 = arith.constant 1.000000e-07 : f32
    %21 = vector.broadcast %cst_10 : f32 to vector<2x1024xf32>
    %22 = arith.addf %20, %21 : vector<2x1024xf32>
    %23 = math.log %22 : vector<2x1024xf32>
    %cst_11 = arith.constant 1.000000e+00 : f32
    %24 = vector.broadcast %cst_11 : f32 to vector<2x1024xf32>
    %25 = arith.subf %24, %20 : vector<2x1024xf32>
    %26 = arith.mulf %25, %25 : vector<2x1024xf32>
    %27 = arith.mulf %23, %26 : vector<2x1024xf32>
    %28 = arith.mulf %27, %1 : vector<2x1024xf32>
    %cst_12 = arith.constant 1.000000e+00 : f32
    %29 = vector.broadcast %cst_12 : f32 to vector<2x1024xf32>
    %30 = arith.subf %29, %20 : vector<2x1024xf32>
    %cst_13 = arith.constant 1.000000e-07 : f32
    %31 = vector.broadcast %cst_13 : f32 to vector<2x1024xf32>
    %32 = arith.addf %30, %31 : vector<2x1024xf32>
    %33 = math.log %32 : vector<2x1024xf32>
    %34 = arith.mulf %20, %20 : vector<2x1024xf32>
    %35 = arith.mulf %33, %34 : vector<2x1024xf32>
    %36 = arith.mulf %35, %8 : vector<2x1024xf32>
    %37 = vector.shape_cast %28 : vector<2x1024xf32> to vector<1x2x1024xf32>
    %cst_14 = arith.constant dense<0.000000e+00> : vector<1xf32>
    %38 = vector.multi_reduction <add>, %37, %cst_14 [1, 2] : vector<1x2x1024xf32> to vector<1xf32>
    %39 = vector.shape_cast %38 : vector<1xf32> to vector<1x1x1xf32>
    %40 = vector.extract %39[0, 0, 0] : f32 from vector<1x1x1xf32>
    %c0_15 = arith.constant 0 : index
    %c0_16 = arith.constant 0 : index
    %41 = memref.load %arg4[%c0_15, %c0_16] : memref<1x7xf32, #tpu.memory_space<smem>>
    memref.store %40, %arg4[%c0_15, %c0_16] : memref<1x7xf32, #tpu.memory_space<smem>>
    %42 = vector.shape_cast %36 : vector<2x1024xf32> to vector<1x2x1024xf32>
    %cst_17 = arith.constant dense<0.000000e+00> : vector<1xf32>
    %43 = vector.multi_reduction <add>, %42, %cst_17 [1, 2] : vector<1x2x1024xf32> to vector<1xf32>
    %44 = vector.shape_cast %43 : vector<1xf32> to vector<1x1x1xf32>
    %45 = vector.extract %44[0, 0, 0] : f32 from vector<1x1x1xf32>
    %c0_18 = arith.constant 0 : index
    %c1 = arith.constant 1 : index
    %46 = memref.load %arg4[%c0_18, %c1] : memref<1x7xf32, #tpu.memory_space<smem>>
    memref.store %45, %arg4[%c0_18, %c1] : memref<1x7xf32, #tpu.memory_space<smem>>
    %c0_19 = arith.constant 0 : index
    %c1_20 = arith.constant 1 : index
    %c0_21 = arith.constant 0 : index
    %47 = vector.load %arg1[%c0_19, %c1_20, %c0_21] : memref<2x3x1024xf32, #tpu.memory_space<vmem>>, vector<2x1x1024xf32>
    %48 = vector.shape_cast %47 : vector<2x1x1024xf32> to vector<2x1024xf32>
    %49 = arith.negf %48 : vector<2x1024xf32>
    %50 = math.exp %49 : vector<2x1024xf32>
    %cst_22 = arith.constant 1.000000e+00 : f32
    %51 = vector.broadcast %cst_22 : f32 to vector<2x1024xf32>
    %52 = arith.addf %51, %50 : vector<2x1024xf32>
    %53 = arith.divf %51, %52 : vector<2x1024xf32>
    %cst_23 = arith.constant 1.000000e-07 : f32
    %54 = vector.broadcast %cst_23 : f32 to vector<2x1024xf32>
    %55 = arith.addf %53, %54 : vector<2x1024xf32>
    %56 = math.log %55 : vector<2x1024xf32>
    %cst_24 = arith.constant 1.000000e+00 : f32
    %57 = vector.broadcast %cst_24 : f32 to vector<2x1024xf32>
    %58 = arith.subf %57, %53 : vector<2x1024xf32>
    %59 = arith.mulf %58, %58 : vector<2x1024xf32>
    %60 = arith.mulf %56, %59 : vector<2x1024xf32>
    %61 = arith.mulf %60, %1 : vector<2x1024xf32>
    %cst_25 = arith.constant 1.000000e+00 : f32
    %62 = vector.broadcast %cst_25 : f32 to vector<2x1024xf32>
    %63 = arith.subf %62, %53 : vector<2x1024xf32>
    %cst_26 = arith.constant 1.000000e-07 : f32
    %64 = vector.broadcast %cst_26 : f32 to vector<2x1024xf32>
    %65 = arith.addf %63, %64 : vector<2x1024xf32>
    %66 = math.log %65 : vector<2x1024xf32>
    %67 = arith.mulf %53, %53 : vector<2x1024xf32>
    %68 = arith.mulf %66, %67 : vector<2x1024xf32>
    %69 = arith.mulf %68, %8 : vector<2x1024xf32>
    %70 = vector.shape_cast %61 : vector<2x1024xf32> to vector<1x2x1024xf32>
    %cst_27 = arith.constant dense<0.000000e+00> : vector<1xf32>
    %71 = vector.multi_reduction <add>, %70, %cst_27 [1, 2] : vector<1x2x1024xf32> to vector<1xf32>
    %72 = vector.shape_cast %71 : vector<1xf32> to vector<1x1x1xf32>
    %73 = vector.extract %72[0, 0, 0] : f32 from vector<1x1x1xf32>
    %c0_28 = arith.constant 0 : index
    %c2 = arith.constant 2 : index
    %74 = memref.load %arg4[%c0_28, %c2] : memref<1x7xf32, #tpu.memory_space<smem>>
    memref.store %73, %arg4[%c0_28, %c2] : memref<1x7xf32, #tpu.memory_space<smem>>
    %75 = vector.shape_cast %69 : vector<2x1024xf32> to vector<1x2x1024xf32>
    %cst_29 = arith.constant dense<0.000000e+00> : vector<1xf32>
    %76 = vector.multi_reduction <add>, %75, %cst_29 [1, 2] : vector<1x2x1024xf32> to vector<1xf32>
    %77 = vector.shape_cast %76 : vector<1xf32> to vector<1x1x1xf32>
    %78 = vector.extract %77[0, 0, 0] : f32 from vector<1x1x1xf32>
    %c0_30 = arith.constant 0 : index
    %c3 = arith.constant 3 : index
    %79 = memref.load %arg4[%c0_30, %c3] : memref<1x7xf32, #tpu.memory_space<smem>>
    memref.store %78, %arg4[%c0_30, %c3] : memref<1x7xf32, #tpu.memory_space<smem>>
    %c0_31 = arith.constant 0 : index
    %c2_32 = arith.constant 2 : index
    %c0_33 = arith.constant 0 : index
    %80 = vector.load %arg1[%c0_31, %c2_32, %c0_33] : memref<2x3x1024xf32, #tpu.memory_space<vmem>>, vector<2x1x1024xf32>
    %81 = vector.shape_cast %80 : vector<2x1x1024xf32> to vector<2x1024xf32>
    %82 = arith.negf %81 : vector<2x1024xf32>
    %83 = math.exp %82 : vector<2x1024xf32>
    %cst_34 = arith.constant 1.000000e+00 : f32
    %84 = vector.broadcast %cst_34 : f32 to vector<2x1024xf32>
    %85 = arith.addf %84, %83 : vector<2x1024xf32>
    %86 = arith.divf %84, %85 : vector<2x1024xf32>
    %cst_35 = arith.constant 1.000000e-07 : f32
    %87 = vector.broadcast %cst_35 : f32 to vector<2x1024xf32>
    %88 = arith.addf %86, %87 : vector<2x1024xf32>
    %89 = math.log %88 : vector<2x1024xf32>
    %cst_36 = arith.constant 1.000000e+00 : f32
    %90 = vector.broadcast %cst_36 : f32 to vector<2x1024xf32>
    %91 = arith.subf %90, %86 : vector<2x1024xf32>
    %92 = arith.mulf %91, %91 : vector<2x1024xf32>
    %93 = arith.mulf %89, %92 : vector<2x1024xf32>
    %94 = arith.mulf %93, %1 : vector<2x1024xf32>
    %cst_37 = arith.constant 1.000000e+00 : f32
    %95 = vector.broadcast %cst_37 : f32 to vector<2x1024xf32>
    %96 = arith.subf %95, %86 : vector<2x1024xf32>
    %cst_38 = arith.constant 1.000000e-07 : f32
    %97 = vector.broadcast %cst_38 : f32 to vector<2x1024xf32>
    %98 = arith.addf %96, %97 : vector<2x1024xf32>
    %99 = math.log %98 : vector<2x1024xf32>
    %100 = arith.mulf %86, %86 : vector<2x1024xf32>
    %101 = arith.mulf %99, %100 : vector<2x1024xf32>
    %102 = arith.mulf %101, %8 : vector<2x1024xf32>
    %103 = vector.shape_cast %94 : vector<2x1024xf32> to vector<1x2x1024xf32>
    %cst_39 = arith.constant dense<0.000000e+00> : vector<1xf32>
    %104 = vector.multi_reduction <add>, %103, %cst_39 [1, 2] : vector<1x2x1024xf32> to vector<1xf32>
    %105 = vector.shape_cast %104 : vector<1xf32> to vector<1x1x1xf32>
    %106 = vector.extract %105[0, 0, 0] : f32 from vector<1x1x1xf32>
    %c0_40 = arith.constant 0 : index
    %c4 = arith.constant 4 : index
    %107 = memref.load %arg4[%c0_40, %c4] : memref<1x7xf32, #tpu.memory_space<smem>>
    memref.store %106, %arg4[%c0_40, %c4] : memref<1x7xf32, #tpu.memory_space<smem>>
    %108 = vector.shape_cast %102 : vector<2x1024xf32> to vector<1x2x1024xf32>
    %cst_41 = arith.constant dense<0.000000e+00> : vector<1xf32>
    %109 = vector.multi_reduction <add>, %108, %cst_41 [1, 2] : vector<1x2x1024xf32> to vector<1xf32>
    %110 = vector.shape_cast %109 : vector<1xf32> to vector<1x1x1xf32>
    %111 = vector.extract %110[0, 0, 0] : f32 from vector<1x1x1xf32>
    %c0_42 = arith.constant 0 : index
    %c5 = arith.constant 5 : index
    %112 = memref.load %arg4[%c0_42, %c5] : memref<1x7xf32, #tpu.memory_space<smem>>
    memref.store %111, %arg4[%c0_42, %c5] : memref<1x7xf32, #tpu.memory_space<smem>>
    return
  }
  func.func @transform_0(%arg0: i32) -> (i32, i32, i32) {
    %c0_i32 = arith.constant 0 : i32
    %c0_i32_0 = arith.constant 0 : i32
    %c0_i32_1 = arith.constant 0 : i32
    return %c0_i32, %c0_i32_0, %arg0 : i32, i32, i32
  }
  func.func @transform_1(%arg0: i32) -> (i32, i32) {
    %c0_i32 = arith.constant 0 : i32
    %c0_i32_0 = arith.constant 0 : i32
    return %c0_i32, %arg0 : i32, i32
  }
  func.func @transform_2(%arg0: i32) -> (i32, i32) {
    %c0_i32 = arith.constant 0 : i32
    %c0_i32_0 = arith.constant 0 : i32
    return %c0_i32, %arg0 : i32, i32
  }
  func.func @transform_3(%arg0: i32) -> (i32, i32) {
    %c0_i32 = arith.constant 0 : i32
    %c0_i32_0 = arith.constant 0 : i32
    return %arg0, %c0_i32 : i32, i32
  }
}

</mosaic_0001>

<bundles_post_ra>
// kernel: tpu_custom_call.1
= control target key start
LH: loop header
LB: loop body
LE: loop exit
PB: predicated region body
PF: predicated region fallthrough
CT: control target
= control target key end

     0   :  { %v35_v0 = vlaneseq  ;;  %v882_v1 = vmov 1983009808   ;;  %s1101_s0 = inlined_call_operand.vmem [shape: f32[2,3,1024], index: 0, kind: input, shape index: {}]   ;;  %s1102_s1 = inlined_call_operand.vmem [shape: f32[2,1024], index: 1, kind: input, shape index: {}]   ;;  %s1103_s2 = inlined_call_operand.vmem [shape: f32[2,1024], index: 2, kind: input, shape index: {}]   ;;  %s1104_s3 = inlined_call_operand.hbm [shape: f32[1,7], index: 3, kind: output, shape index: {}]  }
   0x1   :  { %v33_v2 = vunpack.c.l.s4 %v882_v1  ;;  %v795_v3 = vld [vmem:[%s1101_s0 + $0x1] ss:$4 sm:$0xff]  ;;  %v100_v11 = vld [vmem:[%s1101_s0] ss:$4 sm:$0xff] }
   0x2   :  { %v796_v4 = vld [vmem:[%s1101_s0 + $0x21] ss:$4 sm:$0xff]  ;;  %v916_v6 = vshrl.u32 %v35_v0, 7  ;;  %v797_v9 = vmul.f32 -1.442695, %v795_v3 }
   0x3   :  { %v914_v5 = vld [vmem:[%s1103_s2] sm:$0xff]  ;;  %v34_v8 = vunpack.c.0.s8 %v33_v2  ;;  %v798_v10 = vmul.f32 -1.442695, %v796_v4  ;;  %v793_v12 = vmul.f32 -1.442695, %v100_v11 }
   0x4   :  { %v31_v7 = vcombine.high %v914_v5, %v914_v5  ;;  %822 = vpow2.f32 %v797_v9  ;;  %v792_v14 = vld [vmem:[%s1101_s0 + $0x20] ss:$4 sm:$0xff] }
   0x5   :  { %v37_v13 = vsub.s32 %v34_v8, %v916_v6  ;;  %824 = vpow2.f32 %v798_v10 }
   0x6   :  { %8 = vsyncpa [#allocation3], 0  ;;  %v930_v15 = vld [vmem:[%s1103_s2 + $0x8] sm:$0xff]  ;;  %vm73_vm0 = vcmask 1041408   ;;  %826 = vpow2.f32 %v793_v12  ;;  %v794_v23 = vmul.f32 -1.442695, %v792_v14 }
   0x7   :  { %v38_v16 = vrot.slane %v914_v5, %v37_v13  ;;  %v45_v17 = vrot.slane %v31_v7, %v37_v13  ;;  %v799_v18 = vld [vmem:[%s1101_s0 + $0x2] ss:$4 sm:$0xff]  ;;  %v48_v19 = vcombine.high %v930_v15, %v930_v15  ;;  %v55_v22 = vrot.slane %v930_v15, %v37_v13  ;;  %s870_s11 = scalar_lea.hbm %s1104_s3, 16 }
   0x8   :  { %v800_v25 = vld [vmem:[%s1101_s0 + $0x22] ss:$4 sm:$0xff]  ;;  %v801_v26 = vmul.f32 -1.442695, %v799_v18  ;;  %828 = vpow2.f32 %v794_v23  ;;  %v883_v57 = vmov 1966171168   ;;  %p871_p0 = scmp.ne.s32.totalorder %s1104_s3, %s870_s11  ;;  %p874_p1 = scmp.lt.u32.totalorder %s870_s11, %s1104_s3 }
   0x9   :  { %v46_v20 = vcombine.high %v38_v16, %v38_v16  ;;  %v47_v21 = vcombine.high %v45_v17, %v45_v17  ;;  %v74_v24 = vsel %vm73_vm0, %v38_v16, 0.0  ;;  %v77_v28 = vsel %vm73_vm0, %v45_v17, 0.0  ;;  %v16_v48 = vld [vmem:[%s1102_s1 + $0x8] sm:$0xff]  ;;  %v15_v49 = vld [vmem:[%s1102_s1] sm:$0xff] }
   0xa   :  { %v62_v29 = vrot.slane %v48_v19, %v37_v13  ;;  %v63_v31 = vcombine.high %v55_v22, %v55_v22  ;;  %v802_v33 = vmul.f32 -1.442695, %v800_v25  ;;  %830 = vpow2.f32 %v801_v26  ;;  %p876_p2 = pnand %p874_p1, %p871_p0 }
   0xb   :  { %v75_v27 = vsel %vm73_vm0, %v46_v20, 0.0  ;;  %v79_v32 = vsel %vm73_vm0, %v47_v21, 0.0  ;;  %v81_v36 = vsel %vm73_vm0, %v55_v22, 0.0  ;;  %v20_v53 = vsub.f32 1.0, %v16_v48 }
   0xc   :  { %v76_v30 = vadd.f32 %v75_v27, %v74_v24  ;;  %832 = vpow2.f32 %v802_v33  ;;  %v64_v40 = vcombine.high %v62_v29, %v62_v29  ;;  %v83_v41 = vsel %vm73_vm0, %v63_v31, 0.0 }
   0xd   :  { %v85_v45 = vsel %vm73_vm0, %v62_v29, 0.0  ;;  %v19_v54 = vsub.f32 1.0, %v15_v49  ;;  %v128_v58 = vunpack.c.l.s4 %v883_v57  ;;  %v22_v63 = vmul.f32 %v20_v53, %v20_v53 }
   0xe   :  { %v78_v34 = vadd.f32 %v77_v28, %v76_v30  ;;  %v823_v35 = vpop.eup %822  ;;  %v87_v50 = vsel %vm73_vm0, %v64_v40, 0.0  ;;  %v26_v8 = vsub.f32 1.0, %v930_v15  ;;  %v25_v9 = vsub.f32 1.0, %v914_v5 }
   0xf   :  { %v825_v37 = vpop.eup %824  ;;  %v361_v39 = vadd.f32 1.0, %v823_v35  ;;  %v21_v0 = vmul.f32 %v19_v54, %v19_v54  ;;  %v129_v2 = vunpack.c.0.s8 %v128_v58  ;;  %v24_v13 = vmul.f32 %v22_v63, %v22_v63 }
  0x10   :  { %v80_v38 = vadd.f32 %v79_v32, %v78_v34  ;;  %v362_v42 = vadd.f32 1.0, %v825_v37  ;;  %v827_v43 = vpop.eup %826 }
  0x11   :  { %834 = vrcp.f32 %v361_v39  ;;  %v109_v46 = vadd.f32 1.0, %v827_v43  ;;  %v23_v16 = vmul.f32 %v21_v0, %v21_v0  ;;  %v959_v17 = vsub.s32 %v129_v2, %v916_v6 }
  0x12   :  { %v82_v44 = vadd.f32 %v81_v36, %v80_v38  ;;  %836 = vrcp.f32 %v362_v42  ;;  %v829_v52 = vpop.eup %828  ;;  %v28_v21 = vmul.f32 %v26_v8, %v24_v13 }
  0x13   :  { %838 = vrcp.f32 %v109_v46  ;;  %v110_v59 = vadd.f32 1.0, %v829_v52  ;;  %v27_v22 = vmul.f32 %v25_v9, %v23_v16  ;;  %v133_v25 = vrot.slane %v914_v5, %v959_v17 }
  0x14   :  { %v84_v47 = vadd.f32 %v83_v41, %v82_v44  ;;  %v831_v55 = vpop.eup %830  ;;  %v140_v27 = vrot.slane %v930_v15, %v959_v17  ;;  %v172_v31 = vrot.slane %v28_v21, %v959_v17 }
  0x15   :  { %v575_v61 = vadd.f32 1.0, %v831_v55  ;;  %840 = vrcp.f32 %v110_v59  ;;  %v165_v32 = vrot.slane %v27_v22, %v959_v17 }
  0x16   :  { %v86_v51 = vadd.f32 %v85_v45, %v84_v47  ;;  %v833_v60 = vpop.eup %832  ;;  %v967_v36 = vcombine.low %v133_v25, %v140_v27  ;;  %v969_v38 = vcombine.high %v133_v25, %v140_v27 }
  0x17   :  { %v576_v62 = vadd.f32 1.0, %v833_v60  ;;  %842 = vrcp.f32 %v575_v61  ;;  %v971_v44 = vcombine.low %v165_v32, %v172_v31  ;;  %v973_v45 = vcombine.high %v165_v32, %v172_v31 }
  0x18   :  { %v88_v56 = vadd.f32 %v87_v50, %v86_v51 }
  0x19   :  { %844 = vrcp.f32 %v576_v62 }
  0x1a   :  { %89 = vadd.xlane.f32.xlu0 %v88_v56 }
  0x1b   :  { %v835_v1 = vpop.eup %834 }
  0x1c   :  { %v837_v3 = vpop.eup %836  ;;  %v367_v4 = vadd.f32 1e-07, %v835_v1  ;;  %v373_v7 = vsub.f32 1.0, %v835_v1  ;;  %v387_v40 = vmul.f32 %v835_v1, %v835_v1 }
  0x1d   :  { %v368_v10 = vadd.f32 1e-07, %v837_v3  ;;  %v374_v11 = vsub.f32 1.0, %v837_v3  ;;  %v839_v12 = vpop.eup %838  ;;  %v388_v46 = vmul.f32 %v837_v3, %v837_v3 }
  0x1e   :  { %846 = vlog2.f32 %v367_v4  ;;  %v381_v14 = vadd.f32 1e-07, %v373_v7  ;;  %v115_v19 = vadd.f32 1e-07, %v839_v12  ;;  %v121_v20 = vsub.f32 1.0, %v839_v12 }
  0x1f   :  { %848 = vlog2.f32 %v368_v10  ;;  %v382_v18 = vadd.f32 1e-07, %v374_v11  ;;  %v841_v24 = vpop.eup %840  ;;  %v375_v34 = vmul.f32 %v373_v7, %v373_v7  ;;  %v376_v5 = vmul.f32 %v374_v11, %v374_v11 }
  0x20   :  { %850 = vlog2.f32 %v381_v14  ;;  %v147_v23 = vadd.f32 1e-07, %v121_v20  ;;  %v116_v6 = vadd.f32 1e-07, %v841_v24  ;;  %v122_v28 = vsub.f32 1.0, %v841_v24 }
  0x21   :  { %852 = vlog2.f32 %v115_v19  ;;  %v843_v26 = vpop.eup %842  ;;  %v123_v49 = vmul.f32 %v121_v20, %v121_v20  ;;  %v153_v51 = vmul.f32 %v839_v12, %v839_v12  ;;  %v154_v55 = vmul.f32 %v841_v24, %v841_v24 }
  0x22   :  { %854 = vlog2.f32 %v382_v18  ;;  %v581_v29 = vadd.f32 1e-07, %v843_v26  ;;  %v148_v33 = vadd.f32 1e-07, %v122_v28  ;;  %v587_v37 = vsub.f32 1.0, %v843_v26 }
  0x23   :  { %856 = vlog2.f32 %v147_v23  ;;  %v845_v30 = vpop.eup %844  ;;  %v124_v63 = vmul.f32 %v122_v28, %v122_v28  ;;  %v977_v0 = vmul.f32 %v843_v26, %v843_v26 }
  0x24   :  { %858 = vlog2.f32 %v116_v6  ;;  %v588_v41 = vsub.f32 1.0, %v845_v30  ;;  %v595_v56 = vadd.f32 1e-07, %v587_v37  ;;  %v582_v1 = vadd.f32 1e-07, %v845_v30 }
  0x25   :  { %860 = vlog2.f32 %v581_v29  ;;  %v980_v7 = vmul.f32 %v845_v30, %v845_v30  ;;  %v983_v16 = vmul.f32 %v587_v37, %v587_v37 }
  0x26   :  { %862 = vlog2.f32 %v148_v33  ;;  %v596_v60 = vadd.f32 1e-07, %v588_v41  ;;  %v987_v21 = vmul.f32 %v588_v41, %v588_v41 }
  0x27   :  { %864 = vlog2.f32 %v595_v56 }
  0x28   :  { %v847_v35 = vpop.eup %846  ;;  %866 = vlog2.f32 %v596_v60 }
  0x29   :  { %v849_v15 = vpop.eup %848  ;;  %v370_v39 = vmul.f32 0.6931472, %v847_v35  ;;  %868 = vlog2.f32 %v582_v1 }
  0x2a   :  { %v851_v42 = vpop.eup %850  ;;  %v372_v43 = vmul.f32 0.6931472, %v849_v15 }
  0x2b   :  { %v853_v47 = vpop.eup %852  ;;  %v377_v48 = vmul.f32 %v375_v34, %v370_v39  ;;  %v384_v50 = vmul.f32 0.6931472, %v851_v42 }
  0x2c   :  { %v855_v52 = vpop.eup %854  ;;  %v378_v53 = vmul.f32 %v376_v5, %v372_v43  ;;  %v118_v54 = vmul.f32 0.6931472, %v853_v47 }
  0x2d   :  { %v379_v57 = vmul.f32 %v377_v48, %v967_v36  ;;  %v386_v58 = vmul.f32 0.6931472, %v855_v52  ;;  %v389_v59 = vmul.f32 %v387_v40, %v384_v50  ;;  %v857_v61 = vpop.eup %856 }
  0x2e   :  { %v380_v62 = vmul.f32 %v378_v53, %v969_v38  ;;  %v125_v2 = vmul.f32 %v123_v49, %v118_v54  ;;  %v859_v8 = vpop.eup %858  ;;  %v150_v11 = vmul.f32 0.6931472, %v857_v61 }
  0x2f   :  { %v390_v3 = vmul.f32 %v388_v46, %v386_v58  ;;  %v391_v4 = vmul.f32 %v389_v59, %v971_v44  ;;  %v861_v12 = vpop.eup %860  ;;  %v120_v13 = vmul.f32 0.6931472, %v859_v8 }
  0x30   :  { %v395_v9 = vcombine.low %v379_v57, %v380_v62  ;;  %v396_v10 = vcombine.high %v379_v57, %v380_v62  ;;  %v863_v18 = vpop.eup %862  ;;  %v145_v23 = vmul.f32 %v967_v36, %v125_v2  ;;  %v991_v28 = vmul.f32 %v153_v51, %v150_v11 }
  0x31   :  { %v392_v14 = vmul.f32 %v390_v3, %v973_v45  ;;  %v126_v22 = vmul.f32 %v124_v63, %v120_v13  ;;  %v152_v31 = vmul.f32 0.6931472, %v863_v18  ;;  %v995_v32 = vmul.f32 0.6931472, %v861_v12  ;;  %v865_v51 = vpop.eup %864 }
  0x32   :  { %v403_v19 = vrot.slane %v395_v9, %v959_v17  ;;  %v410_v20 = vrot.slane %v396_v10, %v959_v17  ;;  %v867_v57 = vpop.eup %866 }
  0x33   :  { %v481_v24 = vcombine.low %v391_v4, %v392_v14  ;;  %v482_v25 = vcombine.high %v391_v4, %v392_v14  ;;  %v146_v30 = vmul.f32 %v969_v38, %v126_v22  ;;  %v156_v50 = vmul.f32 %v154_v55, %v152_v31  ;;  %v869_v62 = vpop.eup %868 }
  0x34   :  { %v411_v26 = vcombine.high %v403_v19, %v403_v19  ;;  %v412_v27 = vcombine.high %v410_v20, %v410_v20  ;;  %v419_v6 = vrot.slane %v403_v19, %v959_v17  ;;  %v426_v29 = vrot.slane %v410_v20, %v959_v17 }
  0x35   :  { %v489_v35 = vrot.slane %v481_v24, %v959_v17  ;;  %v496_v5 = vrot.slane %v482_v25, %v959_v17  ;;  %v181_v39 = vcombine.low %v145_v23, %v146_v30  ;;  %v182_v40 = vcombine.high %v145_v23, %v146_v30 }
  0x36   :  { %v433_v33 = vrot.slane %v411_v26, %v959_v17  ;;  %v441_v34 = vcombine.high %v419_v6, %v419_v6  ;;  %v440_v37 = vrot.slane %v412_v27, %v959_v17  ;;  %v453_v15 = vsel %vm73_vm0, %v419_v6, 0.0 }
  0x37   :  { %v442_v41 = vcombine.high %v426_v29, %v426_v29  ;;  %v460_v48 = vsel %vm73_vm0, %v426_v29, 0.0  ;;  %v189_v49 = vrot.slane %v181_v39, %v959_v17  ;;  %v196_v54 = vrot.slane %v182_v40, %v959_v17 }
  0x38   :  { %v443_v42 = vcombine.high %v433_v33, %v433_v33  ;;  %v454_v43 = vsel %vm73_vm0, %v433_v33, 0.0  ;;  %v456_v46 = vsel %vm73_vm0, %v441_v34, 0.0  ;;  %v444_v52 = vcombine.high %v440_v37, %v440_v37 }
  0x39   :  { %v455_v47 = vadd.f32 %v454_v43, %v453_v15  ;;  %v497_v56 = vcombine.high %v489_v35, %v489_v35  ;;  %v462_v59 = vsel %vm73_vm0, %v440_v37, 0.0  ;;  %v197_v60 = vcombine.high %v189_v49, %v189_v49 }
  0x3a   :  { %v458_v53 = vsel %vm73_vm0, %v443_v42, 0.0  ;;  %v205_v61 = vrot.slane %v189_v49, %v959_v17  ;;  %v464_v63 = vsel %vm73_vm0, %v442_v41, 0.0  ;;  %v198_v1 = vcombine.high %v196_v54, %v196_v54 }
  0x3b   :  { %v457_v58 = vadd.f32 %v456_v46, %v455_v47  ;;  %v212_v55 = vrot.slane %v196_v54, %v959_v17  ;;  %v505_v2 = vrot.slane %v489_v35, %v959_v17  ;;  %v219_v4 = vrot.slane %v197_v60, %v959_v17 }
  0x3c   :  { %v227_v8 = vcombine.high %v205_v61, %v205_v61  ;;  %v239_v9 = vsel %vm73_vm0, %v205_v61, 0.0  ;;  %v226_v10 = vrot.slane %v198_v1, %v959_v17  ;;  %v498_v12 = vcombine.high %v496_v5, %v496_v5 }
  0x3d   :  { %v459_v3 = vadd.f32 %v458_v53, %v457_v58  ;;  %v228_v11 = vcombine.high %v212_v55, %v212_v55  ;;  %v519_v13 = vrot.slane %v497_v56, %v959_v17  ;;  %v229_v18 = vcombine.high %v219_v4, %v219_v4 }
  0x3e   :  { %v240_v19 = vsel %vm73_vm0, %v219_v4, 0.0  ;;  %v242_v20 = vsel %vm73_vm0, %v227_v8, 0.0  ;;  %v466_v22 = vsel %vm73_vm0, %v444_v52, 0.0  ;;  %v230_v23 = vcombine.high %v226_v10, %v226_v10 }
  0x3f   :  { %v461_v14 = vadd.f32 %v460_v48, %v459_v3  ;;  %v241_v24 = vadd.f32 %v240_v19, %v239_v9  ;;  %v512_v25 = vrot.slane %v496_v5, %v959_v17  ;;  %v244_v27 = vsel %vm73_vm0, %v229_v18, 0.0 }
  0x40   :  { %v246_v6 = vsel %vm73_vm0, %v212_v55, 0.0  ;;  %v527_v29 = vcombine.high %v505_v2, %v505_v2  ;;  %v248_v31 = vsel %vm73_vm0, %v226_v10, 0.0  ;;  %v250_v33 = vsel %vm73_vm0, %v228_v11, 0.0 }
  0x41   :  { %v463_v26 = vadd.f32 %v462_v59, %v461_v14  ;;  %v243_v30 = vadd.f32 %v242_v20, %v241_v24  ;;  %v529_v34 = vcombine.high %v519_v13, %v519_v13  ;;  %v526_v37 = vrot.slane %v498_v12, %v959_v17 }
  0x42   :  { %v539_v15 = vsel %vm73_vm0, %v505_v2, 0.0  ;;  %v540_v39 = vsel %vm73_vm0, %v519_v13, 0.0  ;;  %v252_v40 = vsel %vm73_vm0, %v230_v23, 0.0  ;;  %v542_v42 = vsel %vm73_vm0, %v527_v29, 0.0 }
  0x43   :  { %v465_v35 = vadd.f32 %v464_v63, %v463_v26  ;;  %v245_v5 = vadd.f32 %v244_v27, %v243_v30  ;;  %v541_v41 = vadd.f32 %v540_v39, %v539_v15  ;;  %v528_v46 = vcombine.high %v512_v25, %v512_v25 }
  0x44   :  { %v530_v47 = vcombine.high %v526_v37, %v526_v37  ;;  %v544_v48 = vsel %vm73_vm0, %v529_v34, 0.0  ;;  %v546_v53 = vsel %vm73_vm0, %v512_v25, 0.0  ;;  %v177_v54 = vmul.f32 %v971_v44, %v991_v28 }
  0x45   :  { %v467_v43 = vadd.f32 %v466_v22, %v465_v35  ;;  %v247_v49 = vadd.f32 %v246_v6, %v245_v5  ;;  %v543_v52 = vadd.f32 %v542_v42, %v541_v41  ;;  %v178_v56 = vmul.f32 %v973_v45, %v156_v50 }
  0x46   :  { %v598_v58 = vmul.f32 0.6931472, %v865_v51  ;;  %v600_v59 = vmul.f32 0.6931472, %v867_v57  ;;  %v586_v60 = vmul.f32 0.6931472, %v869_v62  ;;  %v591_v55 = vmul.f32 %v983_v16, %v995_v32 }
  0x47   :  { %468 = vadd.xlane.f32.xlu1 %v467_v43  ;;  %v249_v61 = vadd.f32 %v248_v31, %v247_v49  ;;  %v545_v63 = vadd.f32 %v544_v48, %v543_v52  ;;  %v548_v1 = vsel %vm73_vm0, %v526_v37, 0.0  ;;  %v267_v2 = vcombine.low %v177_v54, %v178_v56 }
  0x48   :  { %v268_v3 = vcombine.high %v177_v54, %v178_v56  ;;  %v603_v4 = vmul.f32 %v977_v0, %v598_v58  ;;  %v604_v8 = vmul.f32 %v980_v7, %v600_v59  ;;  %v550_v50 = vsel %vm73_vm0, %v528_v46, 0.0 }
  0x49   :  { %v251_v28 = vadd.f32 %v250_v33, %v249_v61  ;;  %v547_v9 = vadd.f32 %v546_v53, %v545_v63  ;;  %v592_v51 = vmul.f32 %v987_v21, %v586_v60  ;;  %v275_v57 = vrot.slane %v267_v2, %v959_v17 }
  0x4a   :  { %v282_v62 = vrot.slane %v268_v3, %v959_v17  ;;  %v605_v10 = vmul.f32 %v603_v4, %v971_v44  ;;  %v606_v16 = vmul.f32 %v604_v8, %v973_v45  ;;  %v552_v0 = vsel %vm73_vm0, %v530_v47, 0.0 }
  0x4b   :  { %v253_v32 = vadd.f32 %v252_v40, %v251_v28  ;;  %v549_v11 = vadd.f32 %v548_v1, %v547_v9  ;;  %v283_v12 = vcombine.high %v275_v57, %v275_v57  ;;  %v291_v7 = vrot.slane %v275_v57, %v959_v17 }
  0x4c   :  { %v593_v13 = vmul.f32 %v591_v55, %v967_v36  ;;  %v594_v14 = vmul.f32 %v592_v51, %v969_v38  ;;  %v284_v18 = vcombine.high %v282_v62, %v282_v62  ;;  %v695_v19 = vcombine.low %v605_v10, %v606_v16 }
  0x4d   :  { %254 = vadd.xlane.f32.xlu0 %v253_v32  ;;  %v551_v21 = vadd.f32 %v550_v50, %v549_v11  ;;  %v696_v20 = vcombine.high %v605_v10, %v606_v16  ;;  %v298_v44 = vrot.slane %v282_v62, %v959_v17  ;;  %v305_v45 = vrot.slane %v283_v12, %v959_v17 }
  0x4e   :  { %v313_v22 = vcombine.high %v291_v7, %v291_v7  ;;  %v325_v24 = vsel %vm73_vm0, %v291_v7, 0.0  ;;  %v703_v25 = vrot.slane %v695_v19, %v959_v17  ;;  %v609_v27 = vcombine.low %v593_v13, %v594_v14 }
  0x4f   :  { %v553_v23 = vadd.f32 %v552_v0, %v551_v21  ;;  %v315_v26 = vcombine.high %v305_v45, %v305_v45  ;;  %v326_v36 = vsel %vm73_vm0, %v305_v45, 0.0  ;;  %v312_v6 = vrot.slane %v284_v18, %v959_v17 }
  0x50   :  { %v328_v38 = vsel %vm73_vm0, %v313_v22, 0.0  ;;  %v314_v29 = vcombine.high %v298_v44, %v298_v44  ;;  %v327_v30 = vadd.f32 %v326_v36, %v325_v24  ;;  %v710_v31 = vrot.slane %v696_v20, %v959_v17 }
  0x51   :  { %554 = vadd.xlane.f32.xlu0 %v553_v23  ;;  %v330_v33 = vsel %vm73_vm0, %v315_v26, 0.0  ;;  %v332_v34 = vsel %vm73_vm0, %v298_v44, 0.0  ;;  %v711_v35 = vcombine.high %v703_v25, %v703_v25  ;;  %v719_v37 = vrot.slane %v703_v25, %v959_v17 }
  0x52   :  { %v316_v15 = vcombine.high %v312_v6, %v312_v6  ;;  %v329_v39 = vadd.f32 %v328_v38, %v327_v30  ;;  %v712_v5 = vcombine.high %v710_v31, %v710_v31  ;;  %v610_v40 = vcombine.high %v593_v13, %v594_v14 }
  0x53   :  { %v733_v41 = vrot.slane %v711_v35, %v959_v17  ;;  %v741_v42 = vcombine.high %v719_v37, %v719_v37  ;;  %v753_v43 = vsel %vm73_vm0, %v719_v37, 0.0  ;;  %v617_v46 = vrot.slane %v609_v27, %v959_v17 }
  0x54   :  { %v331_v47 = vadd.f32 %v330_v33, %v329_v39  ;;  %v334_v48 = vsel %vm73_vm0, %v312_v6, 0.0  ;;  %v726_v49 = vrot.slane %v710_v31, %v959_v17  ;;  %v624_v56 = vrot.slane %v610_v40, %v959_v17 }
  0x55   :  { %v743_v52 = vcombine.high %v733_v41, %v733_v41  ;;  %v754_v53 = vsel %vm73_vm0, %v733_v41, 0.0  ;;  %v756_v54 = vsel %vm73_vm0, %v741_v42, 0.0  ;;  %v336_v59 = vsel %vm73_vm0, %v314_v29, 0.0 }
  0x56   :  { %v333_v58 = vadd.f32 %v332_v34, %v331_v47  ;;  %v755_v60 = vadd.f32 %v754_v53, %v753_v43  ;;  %v338_v61 = vsel %vm73_vm0, %v316_v15, 0.0  ;;  %v740_v63 = vrot.slane %v712_v5, %v959_v17 }
  0x57   :  { %v758_v1 = vsel %vm73_vm0, %v743_v52, 0.0  ;;  %v625_v55 = vcombine.high %v617_v46, %v617_v46  ;;  %v742_v3 = vcombine.high %v726_v49, %v726_v49  ;;  %v633_v8 = vrot.slane %v617_v46, %v959_v17 }
  0x58   :  { %v335_v2 = vadd.f32 %v334_v48, %v333_v58  ;;  %v757_v4 = vadd.f32 %v756_v54, %v755_v60  ;;  %v744_v28 = vcombine.high %v740_v63, %v740_v63  ;;  %v760_v9 = vsel %vm73_vm0, %v726_v49, 0.0 }
  0x59   :  { %v626_v50 = vcombine.high %v624_v56, %v624_v56  ;;  %v647_v51 = vrot.slane %v625_v55, %v959_v17  ;;  %v655_v10 = vcombine.high %v633_v8, %v633_v8  ;;  %v667_v16 = vsel %vm73_vm0, %v633_v8, 0.0 }
  0x5a   :  { %v337_v57 = vadd.f32 %v336_v59, %v335_v2  ;;  %v759_v62 = vadd.f32 %v758_v1, %v757_v4  ;;  %v762_v32 = vsel %vm73_vm0, %v740_v63, 0.0  ;;  %v640_v11 = vrot.slane %v624_v56, %v959_v17 }
  0x5b   :  { %v657_v0 = vcombine.high %v647_v51, %v647_v51  ;;  %v668_v12 = vsel %vm73_vm0, %v647_v51, 0.0  ;;  %v670_v21 = vsel %vm73_vm0, %v655_v10, 0.0  ;;  %v764_v18 = vsel %vm73_vm0, %v742_v3, 0.0 }
  0x5c   :  { %v339_v7 = vadd.f32 %v338_v61, %v337_v57  ;;  %v761_v13 = vadd.f32 %v760_v9, %v759_v62  ;;  %v669_v14 = vadd.f32 %v668_v12, %v667_v16  ;;  %v654_v19 = vrot.slane %v626_v50, %v959_v17 }
  0x5d   :  { %v672_v20 = vsel %vm73_vm0, %v657_v0, 0.0  ;;  %v766_v22 = vsel %vm73_vm0, %v744_v28, 0.0  ;;  %v656_v23 = vcombine.high %v640_v11, %v640_v11  ;;  %v674_v24 = vsel %vm73_vm0, %v640_v11, 0.0 }
  0x5e   :  { %340 = vadd.xlane.f32.xlu1 %v339_v7  ;;  %v763_v44 = vadd.f32 %v762_v32, %v761_v13  ;;  %v671_v45 = vadd.f32 %v670_v21, %v669_v14  ;;  %v658_v36 = vcombine.high %v654_v19, %v654_v19  ;;  %v676_v38 = vsel %vm73_vm0, %v654_v19, 0.0 }
  0x5f   :  { %v678_v29 = vsel %vm73_vm0, %v656_v23, 0.0 }
  0x60   :  { %v765_v25 = vadd.f32 %v764_v18, %v763_v44  ;;  %v673_v26 = vadd.f32 %v672_v20, %v671_v45  ;;  %v680_v30 = vsel %vm73_vm0, %v658_v36, 0.0 }
  0x62   :  { %v767_v27 = vadd.f32 %v766_v22, %v765_v25  ;;  %v675_v6 = vadd.f32 %v674_v24, %v673_v26 }
  0x64   :  { %768 = vadd.xlane.f32.xlu0 %v767_v27  ;;  %v677_v17 = vadd.f32 %v676_v38, %v675_v6 }
  0x66   :  { %v679_v31 = vadd.f32 %v678_v29, %v677_v17 }
  0x68   :  { %v681_v33 = vadd.f32 %v680_v30, %v679_v31 }
  0x6a   :  { %682 = vadd.xlane.f32.xlu1 %v681_v33 }
  0xa7   :  { %v90_v34 = vpop.xlane.xlu0 %89 }
  0xa8   :  { %v91_v35 = vrot.slane %v90_v34, 4 }
  0xaa   :  { %v92_v37 = vadd.f32 %v91_v35, %v90_v34 }
  0xac   :  { %v93_v15 = vrot.slane %v92_v37, 2 }
  0xae   :  { %v94_v39 = vadd.f32 %v93_v15, %v92_v37 }
  0xb0   :  { %v95_v5 = vrot.slane %v94_v39, 1 }
  0xb2   :  { %v96_v40 = vadd.f32 %v95_v5, %v94_v39 }
  0xb4   :  { %803 = vpush %v96_v40 }
  0xd4   :  { %v469_v48 = vpop.xlane.xlu1 %468 }
  0xd5   :  { %v470_v54 = vrot.slane %v469_v48, 4 }
  0xd7   :  { %v471_v59 = vadd.f32 %v470_v54, %v469_v48 }
  0xd9   :  { %v472_v61 = vrot.slane %v471_v59, 2 }
  0xda   :  { %v255_v41 = vpop.xlane.xlu0 %254 }
  0xdb   :  { %v256_v42 = vrot.slane %v255_v41, 4  ;;  %v473_v3 = vadd.f32 %v472_v61, %v471_v59 }
  0xdd   :  { %v257_v43 = vadd.f32 %v256_v42, %v255_v41  ;;  %v474_v51 = vrot.slane %v473_v3, 1 }
  0xde   :  { %v555_v47 = vpop.xlane.xlu0 %554 }
  0xdf   :  { %v258_v46 = vrot.slane %v257_v43, 2  ;;  %v556_v52 = vrot.slane %v555_v47, 4  ;;  %v475_v0 = vadd.f32 %v474_v51, %v473_v3 }
  0xe1   :  { %v259_v49 = vadd.f32 %v258_v46, %v257_v43  ;;  %v557_v58 = vadd.f32 %v556_v52, %v555_v47 }
  0xe3   :  { %v260_v53 = vrot.slane %v259_v49, 1  ;;  %v558_v60 = vrot.slane %v557_v58, 2 }
  0xe5   :  { %s804_s1 = spop %803  ;;  %v261_v56 = vadd.f32 %v260_v53, %v259_v49  ;;  %v559_v2 = vadd.f32 %v558_v60, %v557_v58 }
  0xe6   :  { %99 = sst [smem:[#allocation2 + $0x6]] %s804_s1 }
  0xe7   :  { %805 = vpush %v261_v56  ;;  %v560_v50 = vrot.slane %v559_v2, 1 }
  0xe9   :  { %v561_v32 = vadd.f32 %v560_v50, %v559_v2 }
  0xeb   :  { %v341_v63 = vpop.xlane.xlu1 %340 }
  0xec   :  { %v342_v1 = vrot.slane %v341_v63, 4 }
  0xee   :  { %v343_v55 = vadd.f32 %v342_v1, %v341_v63 }
  0xf0   :  { %v344_v4 = vrot.slane %v343_v55, 2 }
  0xf1   :  { %v769_v8 = vpop.xlane.xlu0 %768 }
  0xf2   :  { %v770_v28 = vrot.slane %v769_v8, 4  ;;  %v345_v9 = vadd.f32 %v344_v4, %v343_v55 }
  0xf4   :  { %v771_v57 = vadd.f32 %v770_v28, %v769_v8  ;;  %v346_v62 = vrot.slane %v345_v9, 1 }
  0xf6   :  { %v772_v10 = vrot.slane %v771_v57, 2  ;;  %v347_v16 = vadd.f32 %v346_v62, %v345_v9 }
  0xf7   :  { %v683_v11 = vpop.xlane.xlu1 %682 }
  0xf8   :  { %v684_v12 = vrot.slane %v683_v11, 4  ;;  %807 = vpush %v347_v16  ;;  %v773_v7 = vadd.f32 %v772_v10, %v771_v57 }
  0xf9   :  { %809 = vpush %v475_v0 }
  0xfa   :  { %v685_v13 = vadd.f32 %v684_v12, %v683_v11  ;;  %811 = vpush %v561_v32  ;;  %v774_v21 = vrot.slane %v773_v7, 1 }
  0xfc   :  { %v686_v14 = vrot.slane %v685_v13, 2  ;;  %v775_v20 = vadd.f32 %v774_v21, %v773_v7 }
  0xfe   :  { %v687_v18 = vadd.f32 %v686_v14, %v685_v13 }
 0x100   :  { %v688_v19 = vrot.slane %v687_v18, 1 }
 0x102   :  { %v689_v44 = vadd.f32 %v688_v19, %v687_v18 }
 0x104   :  { %813 = vpush %v689_v44 }
 0x105   :  { %815 = vpush %v775_v20 }
 0x118   :  { %s806_s30 = spop %805 }
 0x119   :  { %264 = sst [smem:[#allocation2]] %s806_s30 }
 0x129   :  { %s808_s4 = spop %807 }
 0x12a   :  { %350 = sst [smem:[#allocation2 + $0x1]] %s808_s4  ;;  %s810_s5 = spop %809 }
 0x12b   :  { %478 = sst [smem:[#allocation2 + $0x2]] %s810_s5  ;;  %s812_s6 = spop %811 }
 0x12c   :  { %564 = sst [smem:[#allocation2 + $0x3]] %s812_s6 }
 0x135   :  { %s814_s7 = spop %813 }
 0x136   :  { %692 = sst [smem:[#allocation2 + $0x4]] %s814_s7  ;;  %s816_s8 = spop %815 }
 0x137   :  { %778 = sst [smem:[#allocation2 + $0x5]] %s816_s8 }
 0x138   :  { %879 = shalt.err (!%p876_p2)
}
 0x139   :  { %s884_s16 = smov [#allocation2]  }
 0x13a   :  { %786 = dma.smem_to_hbm %s884_s16, 16, %s1104_s3, [#allocation3]  }
 0x13b   :  { %880 = dma.done.wait [#allocation3], 16  }
 0x13c   :  { %881 = vsyncadd [#allocation3], 4294967280 }
 0x13d   :  { %790 = sfence }
 0x13e   :  { %791 = vsyncpa [#allocation3], 1 }

</bundles_post_ra>
